<compile_context>
chip_gen: v7x
topology: tpu7x:2x2x1
jax: 0.10.0
libtpu: 0.0.40
codegen_flags: <defaults>
</compile_context>

<pallas_src>
import math

import jax
import jax.numpy as jnp
from jax.experimental import pallas as pl
from jax.experimental.pallas import tpu as pltpu


def projection_head_kernel(x_ref, w1_ref, b1_ref, w2_ref, b2_ref,
                           gamma_ref, beta_ref, o_ref):
    # Feed MXU operands in their native dtype; accumulate in f32.
    x = x_ref[...]

    # projected = self.projection(x)
    projected = jnp.dot(x, w1_ref[...], preferred_element_type=jnp.float32)
    projected = projected + b1_ref[...].astype(jnp.float32)

    # x = self.gelu(projected) -- exact (erf) GELU to match nn.GELU() default.
    # (tanh-approx would move this VALU work to the otherwise-idle EUP but
    #  changes numerics vs. the PyTorch reference, so we keep erf.)
    h = 0.5 * projected * (1.0 + jax.lax.erf(projected * (1.0 / math.sqrt(2.0))))

    # x = self.fc(x)
    h = jnp.dot(h.astype(w2_ref.dtype), w2_ref[...],
                preferred_element_type=jnp.float32)
    h = h + b2_ref[...].astype(jnp.float32)

    # x = self.dropout(x)  -- eval-mode dropout is identity.
    # TODO(synk): training-mode dropout would use pltpu.prng_seed / prng_random_bits.

    # x = x + projected  (residual)
    h = h + projected

    # x = self.layer_norm(x)  (normalize over last axis, eps=1e-5)
    # One-pass statistics: var = E[h^2] - mean^2.
    inv_n = 1.0 / h.shape[-1]
    s1 = jnp.sum(h, axis=-1, keepdims=True)
    s2 = jnp.sum(h * h, axis=-1, keepdims=True)
    mean = s1 * inv_n
    var = s2 * inv_n - mean * mean
    normed = (h - mean) * jax.lax.rsqrt(var + 1e-5)
    out = normed * gamma_ref[...].astype(jnp.float32) \
          + beta_ref[...].astype(jnp.float32)

    o_ref[...] = out.astype(o_ref.dtype)


def projection_head(x, w1, b1, w2, b2, gamma, beta, *, tm=None):
    B, E = x.shape
    P = w1.shape[1]

    # Large row tile: whole batch if it fits, else 512-row tiles.
    if tm is None:
        tm = B if B <= 512 else 512
    assert B % tm == 0, "batch must be divisible by the row tile"
    assert tm % 8 == 0, "row tile must be a multiple of 8 (sublane)"

    # Grid-invariant parameter blocks: single-buffer them (their index_map is
    # constant, so double-buffering only wastes VMEM — critical on v7x).
    single = pl.Buffered(1)

    grid = (B // tm,)
    return pl.pallas_call(
        projection_head_kernel,
        out_shape=jax.ShapeDtypeStruct((B, P), x.dtype),
        grid_spec=pltpu.PrefetchScalarGridSpec(
            num_scalar_prefetch=0,
            grid=grid,
            in_specs=[
                pl.BlockSpec((tm, E), lambda i: (i, 0)),                          # x tile
                pl.BlockSpec((E, P), lambda i: (0, 0), pipeline_mode=single),     # projection weight
                pl.BlockSpec((1, P), lambda i: (0, 0), pipeline_mode=single),     # projection bias
                pl.BlockSpec((P, P), lambda i: (0, 0), pipeline_mode=single),     # fc weight
                pl.BlockSpec((1, P), lambda i: (0, 0), pipeline_mode=single),     # fc bias
                pl.BlockSpec((1, P), lambda i: (0, 0), pipeline_mode=single),     # layernorm gamma
                pl.BlockSpec((1, P), lambda i: (0, 0), pipeline_mode=single),     # layernorm beta
            ],
            out_specs=pl.BlockSpec((tm, P), lambda i: (i, 0)),
        ),
        compiler_params=pltpu.CompilerParams(
            dimension_semantics=("parallel",),
            vmem_limit_bytes=64 * 1024 * 1024,
        ),
    )(x, w1, b1, w2, b2, gamma, beta)


def reference(x, w1, b1, w2, b2, gamma, beta):
    projected = x @ w1 + b1
    h = jax.nn.gelu(projected, approximate=False)
    h = h @ w2 + b2
    h = h + projected
    mean = jnp.mean(h, axis=-1, keepdims=True)
    var = jnp.var(h, axis=-1, keepdims=True)
    normed = (h - mean) * jax.lax.rsqrt(var + 1e-5)
    return normed * gamma + beta


if __name__ == "__main__":
    # Lane-dense sizes: P (and E) are multiples of 128 so stores are full-lane
    # and the MXU N dimension is fully used; whole batch fits one block.
    batch = 16
    embedding_dim = 256
    projection_dim = 128

    key = jax.random.PRNGKey(0)
    kx, kw1, kb1, kw2, kb2 = jax.random.split(key, 5)

    x = jax.random.normal(kx, (batch, embedding_dim), dtype=jnp.float32)

    # nn.Linear-style init: U(-1/sqrt(fan_in), 1/sqrt(fan_in)); weights stored
    # as (in_features, out_features) so kernel computes x @ W + b.
    bound1 = 1.0 / math.sqrt(embedding_dim)
    w1 = jax.random.uniform(kw1, (embedding_dim, projection_dim),
                            minval=-bound1, maxval=bound1, dtype=jnp.float32)
    b1 = jax.random.uniform(kb1, (1, projection_dim),
                            minval=-bound1, maxval=bound1, dtype=jnp.float32)

    bound2 = 1.0 / math.sqrt(projection_dim)
    w2 = jax.random.uniform(kw2, (projection_dim, projection_dim),
                            minval=-bound2, maxval=bound2, dtype=jnp.float32)
    b2 = jax.random.uniform(kb2, (1, projection_dim),
                            minval=-bound2, maxval=bound2, dtype=jnp.float32)

    # nn.LayerNorm default affine params.
    gamma = jnp.ones((1, projection_dim), dtype=jnp.float32)
    beta = jnp.zeros((1, projection_dim), dtype=jnp.float32)

    out = projection_head(x, w1, b1, w2, b2, gamma, beta)
    out = jax.block_until_ready(out)

    ref = reference(x, w1, b1, w2, b2, gamma, beta)
    assert out.shape == (batch, projection_dim)
    assert jnp.allclose(out, ref, atol=1e-4, rtol=1e-4)

    print("KERNEL_OK")
</pallas_src>

<mosaic_0001>
module attributes {stable_mosaic.version = 11 : i64} {
  func.func @projection_head_kernel(%arg0: i32, %arg1: memref<16x256xf32, #tpu.memory_space<vmem>>, %arg2: memref<256x128xf32, #tpu.memory_space<vmem>>, %arg3: memref<1x128xf32, #tpu.memory_space<vmem>>, %arg4: memref<128x128xf32, #tpu.memory_space<vmem>>, %arg5: memref<1x128xf32, #tpu.memory_space<vmem>>, %arg6: memref<1x128xf32, #tpu.memory_space<vmem>>, %arg7: memref<1x128xf32, #tpu.memory_space<vmem>>, %arg8: memref<16x128xf32, #tpu.memory_space<vmem>>) attributes {dimension_semantics = [#tpu.dimension_semantics<parallel>], iteration_bounds = array<i64: 1>, scalar_prefetch = 0 : i64, scratch_operands = 0 : i64, tpu.core_type = #tpu.core_type<tc>, window_params = [{transform_indices = @transform_0, window_bounds = array<i64: 16, 256>}, {pipeline_mode = #tpu.pipeline_mode<synchronous>, transform_indices = @transform_1, window_bounds = array<i64: 256, 128>}, {pipeline_mode = #tpu.pipeline_mode<synchronous>, transform_indices = @transform_2, window_bounds = array<i64: 1, 128>}, {pipeline_mode = #tpu.pipeline_mode<synchronous>, transform_indices = @transform_3, window_bounds = array<i64: 128, 128>}, {pipeline_mode = #tpu.pipeline_mode<synchronous>, transform_indices = @transform_4, window_bounds = array<i64: 1, 128>}, {pipeline_mode = #tpu.pipeline_mode<synchronous>, transform_indices = @transform_5, window_bounds = array<i64: 1, 128>}, {pipeline_mode = #tpu.pipeline_mode<synchronous>, transform_indices = @transform_6, window_bounds = array<i64: 1, 128>}, {transform_indices = @transform_7, window_bounds = array<i64: 16, 128>}]} {
    %c0 = arith.constant 0 : index
    %c0_0 = arith.constant 0 : index
    %0 = vector.load %arg1[%c0, %c0_0] : memref<16x256xf32, #tpu.memory_space<vmem>>, vector<16x256xf32>
    %c0_1 = arith.constant 0 : index
    %c0_2 = arith.constant 0 : index
    %1 = vector.load %arg2[%c0_1, %c0_2] : memref<256x128xf32, #tpu.memory_space<vmem>>, vector<256x128xf32>
    %cst = arith.constant dense<0.000000e+00> : vector<16x128xf32>
    %2 = tpu.matmul %0, %1, %cst {dimension_numbers = #tpu.dot_dimension_numbers<[1], [0], [0], [1], [0, 0, 1, 1], [], []>} : vector<16x256xf32>, vector<256x128xf32>, vector<16x128xf32> -> vector<16x128xf32>
    %c0_3 = arith.constant 0 : index
    %c0_4 = arith.constant 0 : index
    %3 = vector.load %arg3[%c0_3, %c0_4] : memref<1x128xf32, #tpu.memory_space<vmem>>, vector<1x128xf32>
    %4 = vector.broadcast %3 : vector<1x128xf32> to vector<16x128xf32>
    %5 = arith.addf %2, %4 : vector<16x128xf32>
    %cst_5 = arith.constant 5.000000e-01 : f32
    %6 = vector.broadcast %cst_5 : f32 to vector<16x128xf32>
    %7 = arith.mulf %6, %5 : vector<16x128xf32>
    %cst_6 = arith.constant 0.707106769 : f32
    %8 = vector.broadcast %cst_6 : f32 to vector<16x128xf32>
    %9 = arith.mulf %5, %8 : vector<16x128xf32>
    %10 = math.erf %9 : vector<16x128xf32>
    %cst_7 = arith.constant 1.000000e+00 : f32
    %11 = vector.broadcast %cst_7 : f32 to vector<16x128xf32>
    %12 = arith.addf %11, %10 : vector<16x128xf32>
    %13 = arith.mulf %7, %12 : vector<16x128xf32>
    %c0_8 = arith.constant 0 : index
    %c0_9 = arith.constant 0 : index
    %14 = vector.load %arg4[%c0_8, %c0_9] : memref<128x128xf32, #tpu.memory_space<vmem>>, vector<128x128xf32>
    %cst_10 = arith.constant dense<0.000000e+00> : vector<16x128xf32>
    %15 = tpu.matmul %13, %14, %cst_10 {dimension_numbers = #tpu.dot_dimension_numbers<[1], [0], [0], [1], [0, 0, 1, 1], [], []>} : vector<16x128xf32>, vector<128x128xf32>, vector<16x128xf32> -> vector<16x128xf32>
    %c0_11 = arith.constant 0 : index
    %c0_12 = arith.constant 0 : index
    %16 = vector.load %arg5[%c0_11, %c0_12] : memref<1x128xf32, #tpu.memory_space<vmem>>, vector<1x128xf32>
    %17 = vector.broadcast %16 : vector<1x128xf32> to vector<16x128xf32>
    %18 = arith.addf %15, %17 : vector<16x128xf32>
    %19 = arith.addf %18, %5 : vector<16x128xf32>
    %cst_13 = arith.constant dense<0.000000e+00> : vector<16xf32>
    %20 = vector.multi_reduction <add>, %19, %cst_13 [1] : vector<16x128xf32> to vector<16xf32>
    %21 = vector.shape_cast %20 : vector<16xf32> to vector<16x1xf32>
    %22 = arith.mulf %19, %19 : vector<16x128xf32>
    %cst_14 = arith.constant dense<0.000000e+00> : vector<16xf32>
    %23 = vector.multi_reduction <add>, %22, %cst_14 [1] : vector<16x128xf32> to vector<16xf32>
    %24 = vector.shape_cast %23 : vector<16xf32> to vector<16x1xf32>
    %cst_15 = arith.constant 7.812500e-03 : f32
    %25 = vector.broadcast %cst_15 : f32 to vector<16x1xf32>
    %26 = arith.mulf %21, %25 : vector<16x1xf32>
    %cst_16 = arith.constant 7.812500e-03 : f32
    %27 = vector.broadcast %cst_16 : f32 to vector<16x1xf32>
    %28 = arith.mulf %24, %27 : vector<16x1xf32>
    %29 = arith.mulf %26, %26 : vector<16x1xf32>
    %30 = arith.subf %28, %29 : vector<16x1xf32>
    %31 = vector.broadcast %26 : vector<16x1xf32> to vector<16x128xf32>
    %32 = arith.subf %19, %31 : vector<16x128xf32>
    %cst_17 = arith.constant 9.99999974E-6 : f32
    %33 = vector.broadcast %cst_17 : f32 to vector<16x1xf32>
    %34 = arith.addf %30, %33 : vector<16x1xf32>
    %35 = math.rsqrt %34 : vector<16x1xf32>
    %36 = vector.broadcast %35 : vector<16x1xf32> to vector<16x128xf32>
    %37 = arith.mulf %32, %36 : vector<16x128xf32>
    %c0_18 = arith.constant 0 : index
    %c0_19 = arith.constant 0 : index
    %38 = vector.load %arg6[%c0_18, %c0_19] : memref<1x128xf32, #tpu.memory_space<vmem>>, vector<1x128xf32>
    %39 = vector.broadcast %38 : vector<1x128xf32> to vector<16x128xf32>
    %40 = arith.mulf %37, %39 : vector<16x128xf32>
    %c0_20 = arith.constant 0 : index
    %c0_21 = arith.constant 0 : index
    %41 = vector.load %arg7[%c0_20, %c0_21] : memref<1x128xf32, #tpu.memory_space<vmem>>, vector<1x128xf32>
    %42 = vector.broadcast %41 : vector<1x128xf32> to vector<16x128xf32>
    %43 = arith.addf %40, %42 : vector<16x128xf32>
    %c0_22 = arith.constant 0 : index
    %c0_23 = arith.constant 0 : index
    %44 = vector.load %arg8[%c0_22, %c0_23] : memref<16x128xf32, #tpu.memory_space<vmem>>, vector<16x128xf32>
    tpu.vector_store %arg8[%c0_22, %c0_23], %43 {strides = array<i32>} : memref<16x128xf32, #tpu.memory_space<vmem>>, vector<16x128xf32>,
    return
  }
  func.func @transform_0(%arg0: i32) -> (i32, i32) {
    %c0_i32 = arith.constant 0 : i32
    %c0_i32_0 = arith.constant 0 : i32
    return %arg0, %c0_i32 : i32, i32
  }
  func.func @transform_1(%arg0: i32) -> (i32, i32) {
    %c0_i32 = arith.constant 0 : i32
    %c0_i32_0 = arith.constant 0 : i32
    %c0_i32_1 = arith.constant 0 : i32
    return %c0_i32, %c0_i32_0 : i32, i32
  }
  func.func @transform_2(%arg0: i32) -> (i32, i32) {
    %c0_i32 = arith.constant 0 : i32
    %c0_i32_0 = arith.constant 0 : i32
    %c0_i32_1 = arith.constant 0 : i32
    return %c0_i32, %c0_i32_0 : i32, i32
  }
  func.func @transform_3(%arg0: i32) -> (i32, i32) {
    %c0_i32 = arith.constant 0 : i32
    %c0_i32_0 = arith.constant 0 : i32
    %c0_i32_1 = arith.constant 0 : i32
    return %c0_i32, %c0_i32_0 : i32, i32
  }
  func.func @transform_4(%arg0: i32) -> (i32, i32) {
    %c0_i32 = arith.constant 0 : i32
    %c0_i32_0 = arith.constant 0 : i32
    %c0_i32_1 = arith.constant 0 : i32
    return %c0_i32, %c0_i32_0 : i32, i32
  }
  func.func @transform_5(%arg0: i32) -> (i32, i32) {
    %c0_i32 = arith.constant 0 : i32
    %c0_i32_0 = arith.constant 0 : i32
    %c0_i32_1 = arith.constant 0 : i32
    return %c0_i32, %c0_i32_0 : i32, i32
  }
  func.func @transform_6(%arg0: i32) -> (i32, i32) {
    %c0_i32 = arith.constant 0 : i32
    %c0_i32_0 = arith.constant 0 : i32
    %c0_i32_1 = arith.constant 0 : i32
    return %c0_i32, %c0_i32_0 : i32, i32
  }
  func.func @transform_7(%arg0: i32) -> (i32, i32) {
    %c0_i32 = arith.constant 0 : i32
    %c0_i32_0 = arith.constant 0 : i32
    return %arg0, %c0_i32 : i32, i32
  }
}

</mosaic_0001>

<bundles_post_ra>
// kernel: tpu_custom_call.1
= control target key start
LH: loop header
LB: loop body
LE: loop exit
PB: predicated region body
PF: predicated region fallthrough
CT: control target
= control target key end

     0   :  { %12 = vsyncpa [#allocation3], 0  ;;  %s930_s0 = inlined_call_operand.hbm [shape: f32[16,256], index: 0, kind: input, shape index: {}]   ;;  %s931_s1 = inlined_call_operand.hbm [shape: f32[256,128], index: 1, kind: input, shape index: {}]   ;;  %s932_s2 = inlined_call_operand.hbm [shape: f32[1,128], index: 2, kind: input, shape index: {}]   ;;  %s933_s3 = inlined_call_operand.hbm [shape: f32[128,128], index: 3, kind: input, shape index: {}]   ;;  %s934_s4 = inlined_call_operand.hbm [shape: f32[1,128], index: 4, kind: input, shape index: {}]   ;;  %s935_s5 = inlined_call_operand.hbm [shape: f32[1,128], index: 5, kind: input, shape index: {}]   ;;  %s936_s6 = inlined_call_operand.hbm [shape: f32[1,128], index: 6, kind: input, shape index: {}]   ;;  %s937_s7 = inlined_call_operand.hbm [shape: f32[16,128], index: 7, kind: output, shape index: {}]  }
   0x1   :  { %13 = vsyncpa [#allocation6], 0 }
   0x2   :  { %14 = vsyncpa [#allocation9], 0 }
   0x3   :  { %15 = vsyncpa [#allocation12], 0 }
   0x4   :  { %16 = vsyncpa [#allocation4], 0  ;;  %s773_s24 = smov [#allocation5]   ;;  %s587_s28 = scalar_lea.hbm %s931_s1, 4096 }
   0x5   :  { %s34_s25 = sshll.u32 %s773_s24, 4  ;;  %p588_p0 = scmp.ne.s32.totalorder %s931_s1, %s587_s28  ;;  %s35_s25 = int_to_ptr.vmem [resolvable:$true] %s34_s25 }
   0x6   :  { %p591_p1 = scmp.lt.u32.totalorder %s587_s28, %s931_s1 }
   0x8   :  { %p593_p2 = pnand %p591_p1, %p588_p0 }
   0xa   :  { %596 = shalt.err (!%p593_p2)
}
   0xb   :  { %s597_s10 = scalar_lea.vmem %s35_s25, 4096  ;;  %p602_p4 = scmp.lt.s32.totalorder %s35_s25, %s35_s25 }
   0xc   :  { %p598_p3 = scmp.ne.s32.totalorder %s35_s25, %s597_s10  ;;  %p603_p5 = scmp.lt.s32.totalorder %s597_s10, %s597_s10 }
   0xe   :  { %p604_p6 = por %p603_p5, %p602_p4 }
  0x10   :  { %p605_p7 = pnand %p604_p6, %p598_p3 }
  0x12   :  { %608 = shalt.err (!%p605_p7)
}
  0x13   :  { %s774_s11 = smov 128   ;;  %s775_s12 = smov 8  }
  0x14   :  { %40 = dma.hbm_to_vmem [thread:$0]  %s931_s1, 4096, %s35_s25, [#allocation6], %s774_s11, %s774_s11, %s775_s12  }
  0x15   :  { %s776_s15 = smov [#allocation8]   ;;  %s777_s17 = smov [#allocation11]  }
  0x16   :  { %s56_s16 = sshll.u32 %s776_s15, 4  ;;  %s79_s18 = sshll.u32 %s777_s17, 4  ;;  %s57_s16 = int_to_ptr.vmem [resolvable:$true] %s56_s16  ;;  %s80_s18 = int_to_ptr.vmem [resolvable:$true] %s79_s18 }
  0x17   :  { %s609_s21 = scalar_lea.hbm %s933_s3, 2048 }
  0x18   :  { %p610_p8 = scmp.ne.s32.totalorder %s933_s3, %s609_s21  ;;  %p613_p9 = scmp.lt.u32.totalorder %s609_s21, %s933_s3 }
  0x1a   :  { %p615_p10 = pnand %p613_p9, %p610_p8 }
  0x1c   :  { %618 = shalt.err (!%p615_p10)
}
  0x1d   :  { %s619_s1 = scalar_lea.vmem %s57_s16, 2048  ;;  %p624_p12 = scmp.lt.s32.totalorder %s57_s16, %s57_s16 }
  0x1e   :  { %p620_p11 = scmp.ne.s32.totalorder %s57_s16, %s619_s1  ;;  %p625_p13 = scmp.lt.s32.totalorder %s619_s1, %s619_s1 }
  0x20   :  { %p626_p0 = por %p625_p13, %p624_p12 }
  0x22   :  { %p627_p1 = pnand %p626_p0, %p620_p11 }
  0x24   :  { %630 = shalt.err (!%p627_p1)
}
  0x25   :  { %62 = dma.hbm_to_vmem [thread:$0]  %s933_s3, 2048, %s57_s16, [#allocation9], %s774_s11, %s774_s11, %s775_s12  }
  0x26   :  { %s631_s30 = scalar_lea.hbm %s935_s5, 16 }
  0x27   :  { %p632_p2 = scmp.ne.s32.totalorder %s935_s5, %s631_s30  ;;  %p635_p3 = scmp.lt.u32.totalorder %s631_s30, %s935_s5 }
  0x29   :  { %p637_p4 = pnand %p635_p3, %p632_p2 }
  0x2b   :  { %640 = shalt.err (!%p637_p4)
}
  0x2c   :  { %s641_s14 = scalar_lea.vmem %s80_s18, 16  ;;  %s645_s15 = scalar_lea.vmem %s80_s18, 32 }
  0x2d   :  { %p642_p5 = scmp.ne.s32.totalorder %s80_s18, %s641_s14  ;;  %p646_p6 = scmp.lt.s32.totalorder %s80_s18, %s80_s18 }
  0x2e   :  { %p647_p7 = scmp.lt.s32.totalorder %s645_s15, %s641_s14 }
  0x30   :  { %p648_p8 = por %p647_p7, %p646_p6 }
  0x32   :  { %p649_p9 = pnand %p648_p8, %p642_p5 }
  0x34   :  { %652 = shalt.err (!%p649_p9)
}
  0x35   :  { %82 = dma.hbm_to_vmem [thread:$0]  %s935_s5, 16, %s80_s18, [#allocation12]  }
  0x36   :  { %s778_s17 = smov [#allocation2]   ;;  %s653_s22 = scalar_lea.hbm %s930_s0, 512 }
  0x37   :  { %s22_s19 = sshll.u32 %s778_s17, 4  ;;  %p654_p10 = scmp.ne.s32.totalorder %s930_s0, %s653_s22  ;;  %s23_s19 = int_to_ptr.vmem [resolvable:$true] %s22_s19 }
  0x38   :  { %p657_p11 = scmp.lt.u32.totalorder %s653_s22, %s930_s0 }
  0x3a   :  { %p659_p12 = pnand %p657_p11, %p654_p10 }
  0x3c   :  { %662 = shalt.err (!%p659_p12)
}
  0x3d   :  { %s663_s25 = scalar_lea.vmem %s23_s19, 512  ;;  %p668_p0 = scmp.lt.s32.totalorder %s23_s19, %s23_s19 }
  0x3e   :  { %p664_p13 = scmp.ne.s32.totalorder %s23_s19, %s663_s25  ;;  %p669_p1 = scmp.lt.s32.totalorder %s663_s25, %s663_s25 }
  0x40   :  { %p670_p2 = por %p669_p1, %p668_p0 }
  0x42   :  { %p671_p3 = pnand %p670_p2, %p664_p13 }
  0x44   :  { %674 = shalt.err (!%p671_p3)
}
  0x45   :  { %s779_s5 = smov 256   ;;  %s780_s18 = smov 16  }
  0x46   :  { %28 = dma.hbm_to_vmem [thread:$0]  %s930_s0, 512, %s23_s19, [#allocation3], %s779_s5, %s779_s5, %s780_s18  }
  0x47   :  { %s781_s29 = smov [#allocation7]   ;;  %s782_s8 = smov [#allocation10]  }
  0x48   :  { %s47_s30 = sshll.u32 %s781_s29, 4  ;;  %s69_s9 = sshll.u32 %s782_s8, 4  ;;  %s48_s30 = int_to_ptr.vmem [resolvable:$true] %s47_s30  ;;  %s70_s9 = int_to_ptr.vmem [resolvable:$true] %s69_s9 }
  0x49   :  { %s675_s14 = scalar_lea.hbm %s932_s2, 16 }
  0x4a   :  { %p676_p4 = scmp.ne.s32.totalorder %s932_s2, %s675_s14  ;;  %p679_p5 = scmp.lt.u32.totalorder %s675_s14, %s932_s2 }
  0x4c   :  { %p681_p6 = pnand %p679_p5, %p676_p4 }
  0x4e   :  { %684 = shalt.err (!%p681_p6)
}
  0x4f   :  { %s685_s0 = scalar_lea.vmem %s48_s30, 16  ;;  %s689_s19 = scalar_lea.vmem %s48_s30, 32 }
  0x50   :  { %p686_p7 = scmp.ne.s32.totalorder %s48_s30, %s685_s0  ;;  %p690_p8 = scmp.lt.s32.totalorder %s48_s30, %s48_s30 }
  0x51   :  { %p691_p9 = scmp.lt.s32.totalorder %s689_s19, %s685_s0 }
  0x53   :  { %p692_p10 = por %p691_p9, %p690_p8 }
  0x55   :  { %p693_p11 = pnand %p692_p10, %p686_p7 }
  0x57   :  { %696 = shalt.err (!%p693_p11)
}
  0x58   :  { %50 = dma.hbm_to_vmem [thread:$0]  %s932_s2, 16, %s48_s30, [#allocation6]  }
  0x59   :  { %s697_s24 = scalar_lea.hbm %s934_s4, 16 }
  0x5a   :  { %p698_p12 = scmp.ne.s32.totalorder %s934_s4, %s697_s24  ;;  %p701_p13 = scmp.lt.u32.totalorder %s697_s24, %s934_s4 }
  0x5c   :  { %p703_p0 = pnand %p701_p13, %p698_p12 }
  0x5e   :  { %706 = shalt.err (!%p703_p0)
}
  0x5f   :  { %s707_s18 = scalar_lea.vmem %s70_s9, 16  ;;  %s711_s27 = scalar_lea.vmem %s70_s9, 32 }
  0x60   :  { %p708_p1 = scmp.ne.s32.totalorder %s70_s9, %s707_s18  ;;  %p712_p2 = scmp.lt.s32.totalorder %s70_s9, %s70_s9 }
  0x61   :  { %p713_p3 = scmp.lt.s32.totalorder %s711_s27, %s707_s18 }
  0x63   :  { %p714_p4 = por %p713_p3, %p712_p2 }
  0x65   :  { %p715_p5 = pnand %p714_p4, %p708_p1 }
  0x67   :  { %718 = shalt.err (!%p715_p5)
}
  0x68   :  { %72 = dma.hbm_to_vmem [thread:$0]  %s934_s4, 16, %s70_s9, [#allocation9]  }
  0x69   :  { %s783_s29 = smov [#allocation13]   ;;  %s719_s13 = scalar_lea.hbm %s936_s6, 16 }
  0x6a   :  { %s89_s30 = sshll.u32 %s783_s29, 4  ;;  %p720_p6 = scmp.ne.s32.totalorder %s936_s6, %s719_s13  ;;  %s90_s30 = int_to_ptr.vmem [resolvable:$true] %s89_s30 }
  0x6b   :  { %p723_p7 = scmp.lt.u32.totalorder %s719_s13, %s936_s6 }
  0x6d   :  { %p725_p8 = pnand %p723_p7, %p720_p6 }
  0x6f   :  { %728 = shalt.err (!%p725_p8)
}
  0x70   :  { %s729_s17 = scalar_lea.vmem %s90_s30, 16  ;;  %s733_s4 = scalar_lea.vmem %s90_s30, 32 }
  0x71   :  { %p730_p9 = scmp.ne.s32.totalorder %s90_s30, %s729_s17  ;;  %p734_p10 = scmp.lt.s32.totalorder %s90_s30, %s90_s30 }
  0x72   :  { %p735_p11 = scmp.lt.s32.totalorder %s733_s4, %s729_s17 }
  0x74   :  { %p736_p12 = por %p735_p11, %p734_p10 }
  0x76   :  { %p737_p13 = pnand %p736_p12, %p730_p9 }
  0x78   :  { %740 = shalt.err (!%p737_p13)
}
  0x79   :  { %92 = dma.hbm_to_vmem [thread:$0]  %s936_s6, 16, %s90_s30, [#allocation12]  }
  0x7a   :  { %763 = dma.done.wait [#allocation3], 512  }
  0x7b   :  { %764 = vsyncadd [#allocation3], 4294966784 }
  0x7c   :  { %765 = dma.done.wait [#allocation6], 4112  }
  0x7d   :  { %766 = vsyncadd [#allocation6], 4294963184 }
  0x7e   :  { %767 = dma.done.wait [#allocation9], 2064  }
  0x7f   :  { %768 = vsyncadd [#allocation9], 4294965232 }
  0x80   :  { %769 = dma.done.wait [#allocation12], 32  }
  0x81   :  { %770 = vsyncadd [#allocation12], 4294967264  ;;  %v134_v0 = vld [vmem:[#allocation5 + $0x80] sm:$0xff]  ;;  %v135_v1 = vld [vmem:[#allocation5 + $0x88] sm:$0xff]  ;;  %s784_s6 = smov [#allocation14]  }
  0x82   :  { %v118_v2 = vld [vmem:[#allocation5] sm:$0xff]  ;;  %v503_v3 = vpack.c.bf16 %v135_v1, %v134_v0  ;;  %v119_v4 = vld [vmem:[#allocation5 + $0x8] sm:$0xff]  ;;  %v136_v5 = vld [vmem:[#allocation5 + $0x90] sm:$0xff]  ;;  %s393_s19 = sshll.u32 %s784_s6, 4  ;;  %s394_s19 = int_to_ptr.vmem [resolvable:$true] %s393_s19 }
  0x83   :  { %v137_v6 = vld [vmem:[#allocation5 + $0x98] sm:$0xff]  ;;  %v505_v7 = vpack.c.bf16 %v119_v4, %v118_v2  ;;  %v120_v9 = vld [vmem:[#allocation5 + $0x10] sm:$0xff]  ;;  %v138_v11 = vld [vmem:[#allocation5 + $0xa0] sm:$0xff]  ;;  %s741_s20 = scalar_lea.vmem %s394_s19, 256  ;;  %p746_p1 = scmp.lt.s32.totalorder %s394_s19, %s394_s19 }
  0x84   :  { %v507_v8 = vpack.c.bf16 %v137_v6, %v136_v5  ;;  %v121_v10 = vld [vmem:[#allocation5 + $0x18] sm:$0xff]  ;;  %504 = vmatprep.subr.bf16.mxu0 %v503_v3  ;;  %v139_v12 = vld [vmem:[#allocation5 + $0xa8] sm:$0xff]  ;;  %v122_v15 = vld [vmem:[#allocation5 + $0x20] sm:$0xff]  ;;  %p742_p0 = scmp.ne.s32.totalorder %s394_s19, %s741_s20  ;;  %p747_p2 = scmp.lt.s32.totalorder %s741_s20, %s741_s20 }
  0x85   :  { %506 = vmatpush3.bf16.msra.mxu0 %v505_v7  ;;  %v509_v13 = vpack.c.bf16 %v121_v10, %v120_v9  ;;  %v511_v14 = vpack.c.bf16 %v139_v12, %v138_v11  ;;  %v123_v16 = vld [vmem:[#allocation5 + $0x28] sm:$0xff]  ;;  %v140_v17 = vld [vmem:[#allocation5 + $0xb0] sm:$0xff]  ;;  %v141_v18 = vld [vmem:[#allocation5 + $0xb8] sm:$0xff] }
  0x86   :  { %508 = vmatprep.subr.bf16.mxu0 %v507_v8  ;;  %v513_v19 = vpack.c.bf16 %v123_v16, %v122_v15  ;;  %v515_v20 = vpack.c.bf16 %v141_v18, %v140_v17  ;;  %v124_v21 = vld [vmem:[#allocation5 + $0x30] sm:$0xff]  ;;  %v125_v22 = vld [vmem:[#allocation5 + $0x38] sm:$0xff]  ;;  %v142_v23 = vld [vmem:[#allocation5 + $0xc0] sm:$0xff]  ;;  %p748_p3 = por %p747_p2, %p746_p1 }
  0x87   :  { %v143_v24 = vld [vmem:[#allocation5 + $0xc8] sm:$0xff]  ;;  %v517_v26 = vpack.c.bf16 %v125_v22, %v124_v21  ;;  %v244_v29 = vld [vmem:[#allocation8 + $0x10] sm:$0xff]  ;;  %v126_v31 = vld [vmem:[#allocation5 + $0x40] sm:$0xff] }
  0x88   :  { %v115_v25 = vld [vmem:[#allocation2 + $0x8] sm:$0xff]  ;;  %v519_v30 = vpack.c.bf16 %v143_v24, %v142_v23  ;;  %v245_v34 = vld [vmem:[#allocation8 + $0x18] sm:$0xff]  ;;  %v144_v35 = vld [vmem:[#allocation5 + $0xd0] sm:$0xff]  ;;  %p749_p4 = pnand %p748_p3, %p742_p0 }
  0x89   :  { %510 = vmatpush3.bf16.msra.mxu0 %v509_v13  ;;  %221 = vmatprep.mubr.f32.mxu0 %v115_v25  ;;  %v242_v27 = vld [vmem:[#allocation8] sm:$0xff]  ;;  %v243_v28 = vld [vmem:[#allocation8 + $0x8] sm:$0xff]  ;;  %v145_v36 = vld [vmem:[#allocation5 + $0xd8] sm:$0xff]  ;;  %v539_v37 = vpack.c.bf16 %v245_v34, %v244_v29 }
  0x8a   :  { %512 = vmatprep.subr.bf16.mxu0 %v511_v14  ;;  %v127_v32 = vld [vmem:[#allocation5 + $0x48] sm:$0xff]  ;;  %v535_v33 = vpack.c.bf16 %v243_v28, %v242_v27  ;;  %v523_v39 = vpack.c.bf16 %v145_v36, %v144_v35  ;;  %v128_v40 = vld [vmem:[#allocation5 + $0x50] sm:$0xff]  ;;  %v129_v41 = vld [vmem:[#allocation5 + $0x58] sm:$0xff] }
  0x8b   :  { %v521_v38 = vpack.c.bf16 %v127_v32, %v126_v31  ;;  %v146_v42 = vld [vmem:[#allocation5 + $0xe0] sm:$0xff]  ;;  %v147_v43 = vld [vmem:[#allocation5 + $0xe8] sm:$0xff]  ;;  %v525_v44 = vpack.c.bf16 %v129_v41, %v128_v40  ;;  %v148_v48 = vld [vmem:[#allocation5 + $0xf0] sm:$0xff] }
  0x8c   :  { %536 = vmatprep.subr.bf16.mxu1 %v535_v33  ;;  %v527_v45 = vpack.c.bf16 %v147_v43, %v146_v42  ;;  %v130_v46 = vld [vmem:[#allocation5 + $0x60] sm:$0xff]  ;;  %v131_v47 = vld [vmem:[#allocation5 + $0x68] sm:$0xff]  ;;  %v149_v49 = vld [vmem:[#allocation5 + $0xf8] sm:$0xff] }
  0x8d   :  { %514 = vmatpush3.bf16.msra.mxu0 %v513_v19  ;;  %538 = vmatpush3.bf16.msra.mxu1 %v535_v33  ;;  %v529_v50 = vpack.c.bf16 %v131_v47, %v130_v46  ;;  %v531_v51 = vpack.c.bf16 %v149_v49, %v148_v48  ;;  %v132_v52 = vld [vmem:[#allocation5 + $0x70] sm:$0xff]  ;;  %v133_v53 = vld [vmem:[#allocation5 + $0x78] sm:$0xff]  ;;  %v114_v55 = vld [vmem:[#allocation2] sm:$0xff] }
  0x8e   :  { %516 = vmatprep.subr.bf16.mxu0 %v515_v20  ;;  %540 = vmatprep.subr.bf16.mxu1 %v539_v37  ;;  %v533_v54 = vpack.c.bf16 %v133_v53, %v132_v52  ;;  %v117_v56 = vld [vmem:[#allocation2 + $0x18] sm:$0xff]  ;;  %v116_v57 = vld [vmem:[#allocation2 + $0x10] sm:$0xff]  ;;  %v246_v58 = vld [vmem:[#allocation8 + $0x20] sm:$0xff] }
  0x8f   :  { %v247_v59 = vld [vmem:[#allocation8 + $0x28] sm:$0xff]  ;;  %v248_v61 = vld [vmem:[#allocation8 + $0x30] sm:$0xff]  ;;  %v249_v62 = vld [vmem:[#allocation8 + $0x38] sm:$0xff] }
  0x90   :  { %v543_v60 = vpack.c.bf16 %v247_v59, %v246_v58  ;;  %v547_v63 = vpack.c.bf16 %v249_v62, %v248_v61  ;;  %v250_v0 = vld [vmem:[#allocation8 + $0x40] sm:$0xff]  ;;  %v251_v1 = vld [vmem:[#allocation8 + $0x48] sm:$0xff]  ;;  %v252_v3 = vld [vmem:[#allocation8 + $0x50] sm:$0xff] }
  0x91   :  { %518 = vmatpush3.bf16.msra.mxu0 %v517_v26  ;;  %542 = vmatpush3.bf16.msra.mxu1 %v539_v37  ;;  %v551_v2 = vpack.c.bf16 %v251_v1, %v250_v0  ;;  %v253_v4 = vld [vmem:[#allocation8 + $0x58] sm:$0xff]  ;;  %v254_v5 = vld [vmem:[#allocation8 + $0x60] sm:$0xff]  ;;  %v255_v7 = vld [vmem:[#allocation8 + $0x68] sm:$0xff] }
  0x92   :  { %520 = vmatprep.subr.bf16.mxu0 %v519_v30  ;;  %544 = vmatprep.subr.bf16.mxu1 %v543_v60  ;;  %v555_v6 = vpack.c.bf16 %v253_v4, %v252_v3  ;;  %v559_v8 = vpack.c.bf16 %v255_v7, %v254_v5  ;;  %v256_v9 = vld [vmem:[#allocation8 + $0x70] sm:$0xff]  ;;  %v257_v10 = vld [vmem:[#allocation8 + $0x78] sm:$0xff]  ;;  %v409_v31 = vld [vmem:[#allocation10] ss:$0 sm:$0xff] }
  0x93   :  { %v563_v11 = vpack.c.bf16 %v257_v10, %v256_v9  ;;  %v408_v13 = vld [vmem:[#allocation7] ss:$0 sm:$0xff]  ;;  %v411_v58 = vld [vmem:[#allocation13] ss:$0 sm:$0xff] }
  0x95   :  { %522 = vmatpush3.bf16.msra.mxu0 %v521_v38  ;;  %546 = vmatpush3.bf16.msra.mxu1 %v543_v60 }
  0x96   :  { %524 = vmatprep.subr.bf16.mxu0 %v523_v39  ;;  %548 = vmatprep.subr.bf16.mxu1 %v547_v63 }
  0x99   :  { %526 = vmatpush3.bf16.msra.mxu0 %v525_v44  ;;  %550 = vmatpush3.bf16.msra.mxu1 %v547_v63 }
  0x9a   :  { %528 = vmatprep.subr.bf16.mxu0 %v527_v45  ;;  %552 = vmatprep.subr.bf16.mxu1 %v551_v2 }
  0x9d   :  { %530 = vmatpush3.bf16.msra.mxu0 %v529_v50  ;;  %554 = vmatpush3.bf16.msra.mxu1 %v551_v2 }
  0x9e   :  { %532 = vmatprep.subr.bf16.mxu0 %v531_v51  ;;  %556 = vmatprep.subr.bf16.mxu1 %v555_v6 }
  0xa1   :  { %534 = vmatpush3.bf16.msra.mxu0 %v533_v54  ;;  %558 = vmatpush3.bf16.msra.mxu1 %v555_v6 }
  0xa2   :  { %560 = vmatprep.subr.bf16.mxu1 %v559_v8 }
  0xa4   :  { %222 = vmatmul.mubr.f32.vlgmr.msra.gmra.mrb[0].mxu0 %v114_v55 }
  0xa5   :  { %226 = vmatprep.mubr.f32.mxu0 %v117_v56  ;;  %562 = vmatpush3.bf16.msra.mxu1 %v559_v8  ;;  %v410_v56 = vld [vmem:[#allocation11] ss:$0 sm:$0xff] }
  0xa6   :  { %564 = vmatprep.subr.bf16.mxu1 %v563_v11 }
  0xa8   :  { %227 = vmatmul.mubr.f32.gmra.mrb[2].mxu0 %v116_v57 }
  0xa9   :  { %566 = vmatpush3.bf16.msra.mxu1 %v563_v11 }
 0x177   :  { %v444_v12 = vpop.f32.mrb[0].mxu0 }
 0x178   :  { %v445_v14 = vpop.f32.mrb[1].mxu0 }
 0x179   :  { %v446_v15 = vadd.f32 %v445_v14, %v444_v12 }
 0x17b   :  { %v224_v16 = vadd.f32 %v446_v15, %v408_v13  ;;  %v447_v17 = vpop.f32.mrb[2].mxu0 }
 0x17c   :  { %v448_v18 = vpop.f32.mrb[3].mxu0 }
 0x17d   :  { %v449_v19 = vadd.f32 %v448_v18, %v447_v17  ;;  %v234_v20 = vmul.f32 0.70710677, %v224_v16  ;;  %v232_v24 = vmul.f32 0.5, %v224_v16 }
 0x17f   :  { %v229_v21 = vadd.f32 %v449_v19, %v408_v13  ;;  %579 = verf.f32 %v234_v20 }
 0x181   :  { %v235_v22 = vmul.f32 0.70710677, %v229_v21  ;;  %v233_v28 = vmul.f32 0.5, %v229_v21 }
 0x183   :  { %581 = verf.f32 %v235_v22 }
 0x189   :  { %v580_v23 = vpop.eup %579 }
 0x18a   :  { %v238_v25 = vadd.f32 1.0, %v580_v23 }
 0x18c   :  { %v240_v26 = vmul.f32 %v238_v25, %v232_v24 }
 0x18d   :  { %v582_v27 = vpop.eup %581 }
 0x18e   :  { %500 = vmatprep.mubr.f32.mxu1 %v240_v26  ;;  %v239_v29 = vadd.f32 1.0, %v582_v27 }
 0x190   :  { %v241_v30 = vmul.f32 %v239_v29, %v233_v28 }
 0x192   :  { %501 = vmatmul.mubr.f32.vlgmr.msra.gmra.mrb[0].mxu1 %v241_v30 }
 0x265   :  { %v502_v32 = vpop.f32.mrb[0].mxu1 }
 0x266   :  { %v331_v33 = vpop.f32.mrb[1].mxu1  ;;  %v337_v34 = vadd.f32 %v502_v32, %v409_v31 }
 0x267   :  { %v332_v35 = vadd.f32 %v409_v31, %v331_v33 }
 0x268   :  { %v341_v37 = vadd.f32 %v337_v34, %v229_v21 }
 0x269   :  { %v340_v36 = vadd.f32 %v332_v35, %v224_v16 }
 0x26a   :  { %v347_v39 = vmul.f32 %v341_v37, %v341_v37 }
 0x26b   :  { %342 = vadd.xlane.f32.xlu0 %v340_v36  ;;  %v346_v38 = vmul.f32 %v340_v36, %v340_v36 }
 0x26d   :  { %348 = vadd.xlane.f32.xlu1 %v346_v38 }
 0x26f   :  { %344 = vadd.xlane.f32.xlu0 %v341_v37 }
 0x271   :  { %350 = vadd.xlane.f32.xlu1 %v347_v39 }
 0x2f8   :  { %v343_v40 = vpop.xlane.xlu0 %342 }
 0x2f9   :  { %v352_v41 = vmul.f32 0.0078125, %v343_v40 }
 0x2fa   :  { %v349_v42 = vpop.xlane.xlu1 %348 }
 0x2fb   :  { %v356_v43 = vmul.f32 %v352_v41, %v352_v41  ;;  %v354_v44 = vmul.f32 0.0078125, %v349_v42  ;;  %v360_v54 = vsub.f32 %v340_v36, %v352_v41 }
 0x2fc   :  { %v345_v45 = vpop.xlane.xlu0 %344 }
 0x2fd   :  { %v358_v46 = vsub.f32 %v354_v44, %v356_v43  ;;  %v353_v47 = vmul.f32 0.0078125, %v345_v45 }
 0x2fe   :  { %v351_v48 = vpop.xlane.xlu1 %350 }
 0x2ff   :  { %v362_v49 = vadd.f32 1e-05, %v358_v46  ;;  %v357_v50 = vmul.f32 %v353_v47, %v353_v47  ;;  %v355_v51 = vmul.f32 0.0078125, %v351_v48  ;;  %v361_v59 = vsub.f32 %v341_v37, %v353_v47 }
 0x301   :  { %583 = vrsqrt.f32 %v362_v49  ;;  %v359_v52 = vsub.f32 %v355_v51, %v357_v50 }
 0x303   :  { %v363_v53 = vadd.f32 1e-05, %v359_v52 }
 0x305   :  { %585 = vrsqrt.f32 %v363_v53 }
 0x30b   :  { %v584_v55 = vpop.eup %583 }
 0x30c   :  { %v366_v57 = vmul.f32 %v584_v55, %v360_v54 }
 0x30e   :  { %v375_v60 = vmul.f32 %v410_v56, %v366_v57 }
 0x30f   :  { %v586_v61 = vpop.eup %585 }
 0x310   :  { %v367_v62 = vmul.f32 %v586_v61, %v361_v59  ;;  %v384_v63 = vadd.f32 %v411_v58, %v375_v60 }
 0x312   :  { %v376_v0 = vmul.f32 %v410_v56, %v367_v62  ;;  %386 = vst [vmem:[#allocation14] sm:$0xff] %v384_v63 }
 0x314   :  { %v385_v1 = vadd.f32 %v411_v58, %v376_v0 }
 0x316   :  { %387 = vst [vmem:[#allocation14 + $0x8] sm:$0xff] %v385_v1 }
 0x317   :  { %752 = shalt.err (!%p749_p4)
}
 0x318   :  { %s753_s23 = scalar_lea.hbm %s937_s7, 256 }
 0x319   :  { %p754_p5 = scmp.ne.s32.totalorder %s937_s7, %s753_s23  ;;  %p757_p6 = scmp.lt.u32.totalorder %s753_s23, %s937_s7 }
 0x31b   :  { %p759_p7 = pnand %p757_p6, %p754_p5 }
 0x31d   :  { %762 = shalt.err (!%p759_p7)
}
 0x31e   :  { %399 = dma.vmem_to_hbm [thread:$0]  %s394_s19, 256, %s937_s7, [#allocation4], %s774_s11, %s774_s11, %s775_s12  }
 0x31f   :  { %771 = dma.done.wait [#allocation4], 256  }
 0x320   :  { %772 = vsyncadd [#allocation4], 4294967040 }
 0x321   :  { %403 = vsyncpa [#allocation3], 1 }
 0x322   :  { %404 = vsyncpa [#allocation6], 1 }
 0x323   :  { %405 = vsyncpa [#allocation9], 1 }
 0x324   :  { %406 = vsyncpa [#allocation12], 1 }
 0x325   :  { %407 = vsyncpa [#allocation4], 1 }

</bundles_post_ra>
